<compile_context>
chip_gen: v7x
topology: tpu7x:2x2x1
jax: 0.10.0
libtpu: 0.0.40
codegen_flags: <defaults>
</compile_context>

<pallas_src>
import jax
import jax.numpy as jnp
from jax.experimental import pallas as pl
from jax.experimental.pallas import tpu as pltpu

_LANE = 128


def shared_agent_kernel(x_ref, w_in_ref, w_fc1_ref, w_fc2_ref, w_head_ref,
                        b_ref, out_ref):
    """3x (matmul + bias + ReLU) + fused lane-padded actor/critic head."""
    cdt = w_in_ref.dtype            # matmul operand dtype (f32 or bf16)
    n_h = w_in_ref.shape[1]         # numHidden
    n_h2 = w_fc2_ref.shape[1]       # 2 * numHidden

    x = x_ref[...]

    # shared_input + ReLU (f32 accumulation + f32 bias/ReLU)
    h = jnp.dot(x, w_in_ref[...], preferred_element_type=jnp.float32)
    h = jnp.maximum(h + b_ref[0:1, :n_h], 0.0)

    # shared_fc1 + ReLU
    h = jnp.dot(h.astype(cdt), w_fc1_ref[...], preferred_element_type=jnp.float32)
    h = jnp.maximum(h + b_ref[1:2, :n_h], 0.0)

    # shared_fc2 + ReLU
    h = jnp.dot(h.astype(cdt), w_fc2_ref[...], preferred_element_type=jnp.float32)
    h = jnp.maximum(h + b_ref[2:3, :n_h2], 0.0)

    # fused actor + critic head, zero-padded to 128 lanes -> one unmasked store
    out_ref[...] = (
        jnp.dot(h.astype(cdt), w_head_ref[...], preferred_element_type=jnp.float32)
        + b_ref[3:4, :]
    )


def _round_up(n, m):
    return ((n + m - 1) // m) * m


def shared_agent_forward(x, params, *, block_batch=512, compute_dtype=jnp.float32):
    """x: (B, numObs) float32. params: dict of pre-transposed weights/biases.

    Returns (logits (B, numActions), value (B, 1)) in float32.
    """
    x = jnp.asarray(x, jnp.float32)
    batch, num_obs = x.shape
    num_hidden = params["w_in"].shape[1]
    num_actions = params["w_act"].shape[1]
    n_h2 = 2 * num_hidden
    assert num_actions + 1 <= _LANE, "fused head assumes numActions + 1 <= 128"

    # --- Fuse actor + critic into one lane-padded (2H, 128) head ------------
    w_head = jnp.zeros((n_h2, _LANE), jnp.float32)
    w_head = w_head.at[:, :num_actions].set(params["w_act"])
    w_head = w_head.at[:, num_actions:num_actions + 1].set(params["w_crit"])
    b_head = jnp.zeros((_LANE,), jnp.float32)
    b_head = b_head.at[:num_actions].set(params["b_act"].reshape(-1))
    b_head = b_head.at[num_actions].set(params["b_crit"].reshape(-1)[0])

    # --- Pack all biases into one (4, 128) f32 buffer (single DMA) ----------
    def _pad_lane(b):
        b = b.reshape(-1)
        return jnp.pad(b, (0, _LANE - b.shape[0]))

    b_pack = jnp.stack([
        _pad_lane(params["b_in"]),
        _pad_lane(params["b_fc1"]),
        _pad_lane(params["b_fc2"]),
        b_head,
    ]).astype(jnp.float32)

    # --- Matmul operands (optionally bf16; accumulation stays f32) ----------
    cdt = compute_dtype
    w_in = params["w_in"].astype(cdt)
    w_fc1 = params["w_fc1"].astype(cdt)
    w_fc2 = params["w_fc2"].astype(cdt)
    w_head = w_head.astype(cdt)

    # --- Batch tiling: pad rows to a multiple of the batch tile -------------
    tb = min(block_batch, _round_up(batch, 8))
    tb = _round_up(tb, 8)
    batch_pad = _round_up(batch, tb)
    x_p = jnp.pad(x, ((0, batch_pad - batch), (0, 0))).astype(cdt)
    n_steps = batch_pad // tb

    def resident(shape):
        return pl.BlockSpec(shape, lambda i: (0, 0))

    out = pl.pallas_call(
        shared_agent_kernel,
        out_shape=jax.ShapeDtypeStruct((batch_pad, _LANE), jnp.float32),
        grid_spec=pltpu.PrefetchScalarGridSpec(
            num_scalar_prefetch=0,
            grid=(n_steps,),
            in_specs=[
                pl.BlockSpec((tb, num_obs), lambda i: (i, 0)),  # activations tiled
                resident(w_in.shape),
                resident(w_fc1.shape),
                resident(w_fc2.shape),
                resident(w_head.shape),
                resident(b_pack.shape),
            ],
            out_specs=pl.BlockSpec((tb, _LANE), lambda i: (i, 0)),
        ),
        compiler_params=pltpu.CompilerParams(
            dimension_semantics=("parallel",),  # lets v7x megacore split batch
        ),
    )(x_p, w_in, w_fc1, w_fc2, w_head, b_pack)

    logits = out[:batch, :num_actions]
    value = out[:batch, num_actions:num_actions + 1]
    return logits, value


def init_params(key, num_obs, num_actions, num_hidden):
    """Deterministic PyTorch-Linear-style init (uniform +-1/sqrt(fan_in)).

    Weights are stored already transposed to (in, out)."""
    def linear(k, fan_in, fan_out):
        kw, kb = jax.random.split(k)
        bound = 1.0 / jnp.sqrt(fan_in)
        w = jax.random.uniform(kw, (fan_in, fan_out), jnp.float32, -bound, bound)
        b = jax.random.uniform(kb, (1, fan_out), jnp.float32, -bound, bound)
        return w, b

    k_in, k_fc1, k_fc2, k_act, k_crit = jax.random.split(key, 5)
    w_in, b_in = linear(k_in, num_obs, num_hidden)
    w_fc1, b_fc1 = linear(k_fc1, num_hidden, num_hidden)
    w_fc2, b_fc2 = linear(k_fc2, num_hidden, 2 * num_hidden)
    w_act, b_act = linear(k_act, 2 * num_hidden, num_actions)
    w_crit, b_crit = linear(k_crit, 2 * num_hidden, 1)
    return dict(
        w_in=w_in, b_in=b_in,
        w_fc1=w_fc1, b_fc1=b_fc1,
        w_fc2=w_fc2, b_fc2=b_fc2,
        w_act=w_act, b_act=b_act,
        w_crit=w_crit, b_crit=b_crit,
    )


def reference_forward(x, p):
    h = jnp.maximum(x @ p["w_in"] + p["b_in"], 0.0)
    h = jnp.maximum(h @ p["w_fc1"] + p["b_fc1"], 0.0)
    h = jnp.maximum(h @ p["w_fc2"] + p["b_fc2"], 0.0)
    return h @ p["w_act"] + p["b_act"], h @ p["w_crit"] + p["b_crit"]


if __name__ == "__main__":
    NUM_OBS = 16
    NUM_ACTIONS = 4
    NUM_HIDDEN = 32
    BATCH = 200   # deliberately not a multiple of the tile to exercise padding

    key = jax.random.PRNGKey(0)
    k_params, k_x = jax.random.split(key)

    params = init_params(k_params, NUM_OBS, NUM_ACTIONS, NUM_HIDDEN)
    x = jax.random.normal(k_x, (BATCH, NUM_OBS), jnp.float32)

    ref_logits, ref_value = reference_forward(x, params)

    # f32 path (multi-step batch grid: TB=64 -> padded batch 256, 4 grid steps)
    logits, value = shared_agent_forward(x, params, block_batch=64)
    jax.block_until_ready((logits, value))
    assert logits.shape == (BATCH, NUM_ACTIONS)
    assert value.shape == (BATCH, 1)
    assert jnp.allclose(logits, ref_logits, atol=1e-5, rtol=1e-5)
    assert jnp.allclose(value, ref_value, atol=1e-5, rtol=1e-5)

    # bf16-operand path (MXU-native on v6e/v7x); f32 accumulation, looser tol.
    logits_bf, value_bf = shared_agent_forward(
        x, params, block_batch=64, compute_dtype=jnp.bfloat16)
    jax.block_until_ready((logits_bf, value_bf))
    assert jnp.allclose(logits_bf, ref_logits, atol=1e-1, rtol=1e-1)
    assert jnp.allclose(value_bf, ref_value, atol=1e-1, rtol=1e-1)

    print("KERNEL_OK")
</pallas_src>

<mosaic_0001>
module attributes {stable_mosaic.version = 11 : i64} {
  func.func @shared_agent_kernel(%arg0: i32, %arg1: memref<64x16xf32, #tpu.memory_space<vmem>>, %arg2: memref<16x32xf32, #tpu.memory_space<vmem>>, %arg3: memref<32x32xf32, #tpu.memory_space<vmem>>, %arg4: memref<32x64xf32, #tpu.memory_space<vmem>>, %arg5: memref<64x128xf32, #tpu.memory_space<vmem>>, %arg6: memref<4x128xf32, #tpu.memory_space<vmem>>, %arg7: memref<64x128xf32, #tpu.memory_space<vmem>>) attributes {dimension_semantics = [#tpu.dimension_semantics<parallel>], iteration_bounds = array<i64: 4>, scalar_prefetch = 0 : i64, scratch_operands = 0 : i64, tpu.core_type = #tpu.core_type<tc>, window_params = [{transform_indices = @transform_0, window_bounds = array<i64: 64, 16>}, {pipeline_mode = #tpu.pipeline_mode<synchronous>, transform_indices = @transform_1, window_bounds = array<i64: 16, 32>}, {pipeline_mode = #tpu.pipeline_mode<synchronous>, transform_indices = @transform_2, window_bounds = array<i64: 32, 32>}, {pipeline_mode = #tpu.pipeline_mode<synchronous>, transform_indices = @transform_3, window_bounds = array<i64: 32, 64>}, {pipeline_mode = #tpu.pipeline_mode<synchronous>, transform_indices = @transform_4, window_bounds = array<i64: 64, 128>}, {pipeline_mode = #tpu.pipeline_mode<synchronous>, transform_indices = @transform_5, window_bounds = array<i64: 4, 128>}, {transform_indices = @transform_6, window_bounds = array<i64: 64, 128>}]} {
    %c0 = arith.constant 0 : index
    %c0_0 = arith.constant 0 : index
    %0 = vector.load %arg1[%c0, %c0_0] : memref<64x16xf32, #tpu.memory_space<vmem>>, vector<64x16xf32>
    %c0_1 = arith.constant 0 : index
    %c0_2 = arith.constant 0 : index
    %1 = vector.load %arg2[%c0_1, %c0_2] : memref<16x32xf32, #tpu.memory_space<vmem>>, vector<16x32xf32>
    %cst = arith.constant dense<0.000000e+00> : vector<64x32xf32>
    %2 = tpu.matmul %0, %1, %cst {dimension_numbers = #tpu.dot_dimension_numbers<[1], [0], [0], [1], [0, 0, 1, 1], [], []>} : vector<64x16xf32>, vector<16x32xf32>, vector<64x32xf32> -> vector<64x32xf32>
    %c0_3 = arith.constant 0 : index
    %c0_4 = arith.constant 0 : index
    %3 = vector.load %arg6[%c0_3, %c0_4] : memref<4x128xf32, #tpu.memory_space<vmem>>, vector<1x32xf32>
    %4 = vector.broadcast %3 : vector<1x32xf32> to vector<64x32xf32>
    %5 = arith.addf %2, %4 : vector<64x32xf32>
    %cst_5 = arith.constant 0.000000e+00 : f32
    %6 = vector.broadcast %cst_5 : f32 to vector<64x32xf32>
    %7 = arith.maximumf %5, %6 : vector<64x32xf32>
    %c0_6 = arith.constant 0 : index
    %c0_7 = arith.constant 0 : index
    %8 = vector.load %arg3[%c0_6, %c0_7] : memref<32x32xf32, #tpu.memory_space<vmem>>, vector<32x32xf32>
    %cst_8 = arith.constant dense<0.000000e+00> : vector<64x32xf32>
    %9 = tpu.matmul %7, %8, %cst_8 {dimension_numbers = #tpu.dot_dimension_numbers<[1], [0], [0], [1], [0, 0, 1, 1], [], []>} : vector<64x32xf32>, vector<32x32xf32>, vector<64x32xf32> -> vector<64x32xf32>
    %c1 = arith.constant 1 : index
    %c0_9 = arith.constant 0 : index
    %10 = vector.load %arg6[%c1, %c0_9] : memref<4x128xf32, #tpu.memory_space<vmem>>, vector<1x32xf32>
    %11 = vector.broadcast %10 : vector<1x32xf32> to vector<64x32xf32>
    %12 = arith.addf %9, %11 : vector<64x32xf32>
    %cst_10 = arith.constant 0.000000e+00 : f32
    %13 = vector.broadcast %cst_10 : f32 to vector<64x32xf32>
    %14 = arith.maximumf %12, %13 : vector<64x32xf32>
    %c0_11 = arith.constant 0 : index
    %c0_12 = arith.constant 0 : index
    %15 = vector.load %arg4[%c0_11, %c0_12] : memref<32x64xf32, #tpu.memory_space<vmem>>, vector<32x64xf32>
    %cst_13 = arith.constant dense<0.000000e+00> : vector<64x64xf32>
    %16 = tpu.matmul %14, %15, %cst_13 {dimension_numbers = #tpu.dot_dimension_numbers<[1], [0], [0], [1], [0, 0, 1, 1], [], []>} : vector<64x32xf32>, vector<32x64xf32>, vector<64x64xf32> -> vector<64x64xf32>
    %c2 = arith.constant 2 : index
    %c0_14 = arith.constant 0 : index
    %17 = vector.load %arg6[%c2, %c0_14] : memref<4x128xf32, #tpu.memory_space<vmem>>, vector<1x64xf32>
    %18 = vector.broadcast %17 : vector<1x64xf32> to vector<64x64xf32>
    %19 = arith.addf %16, %18 : vector<64x64xf32>
    %cst_15 = arith.constant 0.000000e+00 : f32
    %20 = vector.broadcast %cst_15 : f32 to vector<64x64xf32>
    %21 = arith.maximumf %19, %20 : vector<64x64xf32>
    %c0_16 = arith.constant 0 : index
    %c0_17 = arith.constant 0 : index
    %22 = vector.load %arg5[%c0_16, %c0_17] : memref<64x128xf32, #tpu.memory_space<vmem>>, vector<64x128xf32>
    %cst_18 = arith.constant dense<0.000000e+00> : vector<64x128xf32>
    %23 = tpu.matmul %21, %22, %cst_18 {dimension_numbers = #tpu.dot_dimension_numbers<[1], [0], [0], [1], [0, 0, 1, 1], [], []>} : vector<64x64xf32>, vector<64x128xf32>, vector<64x128xf32> -> vector<64x128xf32>
    %c3 = arith.constant 3 : index
    %c0_19 = arith.constant 0 : index
    %24 = vector.load %arg6[%c3, %c0_19] : memref<4x128xf32, #tpu.memory_space<vmem>>, vector<1x128xf32>
    %25 = vector.broadcast %24 : vector<1x128xf32> to vector<64x128xf32>
    %26 = arith.addf %23, %25 : vector<64x128xf32>
    %c0_20 = arith.constant 0 : index
    %c0_21 = arith.constant 0 : index
    %27 = vector.load %arg7[%c0_20, %c0_21] : memref<64x128xf32, #tpu.memory_space<vmem>>, vector<64x128xf32>
    tpu.vector_store %arg7[%c0_20, %c0_21], %26 {strides = array<i32>} : memref<64x128xf32, #tpu.memory_space<vmem>>, vector<64x128xf32>,
    return
  }
  func.func @transform_0(%arg0: i32) -> (i32, i32) {
    %c0_i32 = arith.constant 0 : i32
    %c0_i32_0 = arith.constant 0 : i32
    return %arg0, %c0_i32 : i32, i32
  }
  func.func @transform_1(%arg0: i32) -> (i32, i32) {
    %c0_i32 = arith.constant 0 : i32
    %c0_i32_0 = arith.constant 0 : i32
    %c0_i32_1 = arith.constant 0 : i32
    return %c0_i32, %c0_i32_0 : i32, i32
  }
  func.func @transform_2(%arg0: i32) -> (i32, i32) {
    %c0_i32 = arith.constant 0 : i32
    %c0_i32_0 = arith.constant 0 : i32
    %c0_i32_1 = arith.constant 0 : i32
    return %c0_i32, %c0_i32_0 : i32, i32
  }
  func.func @transform_3(%arg0: i32) -> (i32, i32) {
    %c0_i32 = arith.constant 0 : i32
    %c0_i32_0 = arith.constant 0 : i32
    %c0_i32_1 = arith.constant 0 : i32
    return %c0_i32, %c0_i32_0 : i32, i32
  }
  func.func @transform_4(%arg0: i32) -> (i32, i32) {
    %c0_i32 = arith.constant 0 : i32
    %c0_i32_0 = arith.constant 0 : i32
    %c0_i32_1 = arith.constant 0 : i32
    return %c0_i32, %c0_i32_0 : i32, i32
  }
  func.func @transform_5(%arg0: i32) -> (i32, i32) {
    %c0_i32 = arith.constant 0 : i32
    %c0_i32_0 = arith.constant 0 : i32
    %c0_i32_1 = arith.constant 0 : i32
    return %c0_i32, %c0_i32_0 : i32, i32
  }
  func.func @transform_6(%arg0: i32) -> (i32, i32) {
    %c0_i32 = arith.constant 0 : i32
    %c0_i32_0 = arith.constant 0 : i32
    return %arg0, %c0_i32 : i32, i32
  }
}

</mosaic_0001>

<bundles_post_ra>
// kernel: tpu_custom_call.1
= control target key start
LH: loop header
LB: loop body
LE: loop exit
PB: predicated region body
PF: predicated region fallthrough
CT: control target
= control target key end

     0   :  { %11 = vsyncpa [#allocation3], 0  ;;  %s1492_s0 = inlined_call_operand.vmem [shape: f32[256,16], index: 0, kind: input, shape index: {}]   ;;  %s1493_s1 = inlined_call_operand.vmem [shape: f32[16,32], index: 1, kind: input, shape index: {}]   ;;  %s1494_s2 = inlined_call_operand.vmem [shape: f32[32,32], index: 2, kind: input, shape index: {}]   ;;  %s1495_s3 = inlined_call_operand.vmem [shape: f32[32,64], index: 3, kind: input, shape index: {}]   ;;  %s1496_s4 = inlined_call_operand.vmem [shape: f32[64,128], index: 4, kind: input, shape index: {}]   ;;  %s1497_s5 = inlined_call_operand.vmem [shape: f32[4,128], index: 5, kind: input, shape index: {}]   ;;  %s1498_s6 = inlined_call_operand.hbm [shape: f32[256,128], index: 6, kind: output, shape index: {}]  }
   0x1   :  { %13 = vsyncpa [#allocation3 + $0x1], 0  ;;  %s1288_s21 = smov 0   ;;  %s1290_s22 = smov 0  }
   0x2   :  { %s1292_s23 = smov 0   ;;  %s1294_s24 = smov 0  }
   0x3 LB: > { %s1309_s25 = sadd.s32 4294967295, %s1248_s24   ;;  %s926_s26 = sadd.s32 4294967294, %s1248_s24   ;;  %s1248_s24 = sphi %s1294_s24, %s1504_s24   ;;  %s1244_s23 = sphi %s1292_s23, %s1503_s23   ;;  %s1240_s22 = sphi %s1290_s22, %s1502_s22   ;;  %s1236_s21 = sphi %s1288_s21, %s1501_s21  }
   0x4   : > { %s1313_s27 = sadd.s32 1, %s1248_s24   ;;  %s157_s28 = sadd.s32 1, %s1244_s23 }
   0x5   : > { %s154_s29 = ssub.s32 %s1248_s24, %s1313_s27  ;;  %p167_p0 = scmp.ne.s32.totalorder %s1244_s23, %s1240_s22 }
   0x6   : > { %p155_p1 = scmp.eq.s32.totalorder %s154_s29, 0  ;;  %p168_p2 = scmp.eq.s32.totalorder %s1309_s25, 3 }
   0x7   : > { %p173_p3 = scmp.ne.s32.totalorder %s1240_s22, %s1236_s21  ;;  %p174_p4 = scmp.eq.s32.totalorder %s926_s26, 3 }
   0x8   : > { %s1324_s30 = scalar_select %p155_p1, %s1244_s23, %s157_s28  }
   0x9   : > { %p1326_p5 = por %p168_p2, %p167_p0  ;;  %p1330_p6 = por %p174_p4, %p173_p3 }
   0xa   : > { %p929_p7 = scmp.ge.s32.totalorder %s1248_s24, 1  ;;  %p216_p8 = scmp.lt.s32.totalorder %s1248_s24, 5 }
   0xc   : > { %p217_p9 = pnand %p929_p7, %p216_p8 }
   0xd   : > { %v261_v0 = vld [vmem:[%s1493_s1] sm:$0xff] (!%p217_p9)  ;;  %v262_v1 = vld [vmem:[%s1493_s1 + $0x8] sm:$0xff] (!%p217_p9)  ;;  %s931_s13 = sshll.u32 (!%p217_p9), %s1309_s25, 3  ;;  %vm268_vm0 = vcmask (!%p217_p9), 130048   ;;  %v408_v14 = vld [vmem:[%s1494_s2 + $0x10] sm:$0xff] (!%p217_p9)  ;;  %vm415_vm1 = vcmask (!%p217_p9), 261120  }
   0xe   : > { %220 = sbr.rel (%p217_p9) target bundleno = 922 (0x39a), region = 44  ;;  %v406_v2 = vld [vmem:[%s1494_s2] sm:$0xff] (!%p217_p9)  ;;  %v1109_v3 = vpack.c.bf16 (!%p217_p9), %v262_v1, %v261_v0  ;;  %p247_p10 = scmp.lt.s32.totalorder (!%p217_p9), %s931_s13, 31  ;;  %v407_v4 = vld [vmem:[%s1494_s2 + $0x8] sm:$0xff] (!%p217_p9)  ;;  %v409_v15 = vld [vmem:[%s1494_s2 + $0x18] sm:$0xff] (!%p217_p9)  ;;  %vm712_vm2 = vcmask (!%p217_p9), 523264  }
   0xf   : > { %v1113_v5 = vpack.c.bf16 (!%p217_p9), %v407_v4, %v406_v2  ;;  %v1117_v16 = vpack.c.bf16 (!%p217_p9), %v409_v15, %v408_v14  ;;  %v553_v17 = vld [vmem:[%s1495_s3] sm:$0xff] (!%p217_p9)  ;;  %v554_v18 = vld [vmem:[%s1495_s3 + $0x8] sm:$0xff] (!%p217_p9)  ;;  %v555_v19 = vld [vmem:[%s1495_s3 + $0x10] sm:$0xff] (!%p217_p9)  ;;  %s243_s11 = sand.u32 (!%p217_p9), 1, %s1240_s22   ;;  %s974_s16 = sshll.u32 (!%p217_p9), %s1309_s25, 10 }
  0x10   : > { %1110 = vmatprep.subr.bf16.mxu0 (!%p217_p9), %v1109_v3  ;;  %v1121_v20 = vpack.c.bf16 (!%p217_p9), %v554_v18, %v553_v17  ;;  %v556_v21 = vld [vmem:[%s1495_s3 + $0x18] sm:$0xff] (!%p217_p9)  ;;  %v933_v23 = vld [vmem:[%s1497_s5] ss:$0 sm:$0xff] (!%p217_p9)  ;;  %v700_v49 = vld [vmem:[%s1496_s4 + $0x8] sm:$0xff] (!%p217_p9)  ;;  %s930_s12 = sshll.u32 (!%p217_p9), %s243_s11, 6  ;;  %s1445_s20 = scalar_lea.hbm (!%p217_p9), %s1498_s6, %s974_s16 }
  0x11   : > { %1112 = vmatpush3.bf16.msra.mxu0 (!%p217_p9), %v1109_v3  ;;  %1114 = vmatprep.subr.bf16.mxu1 (!%p217_p9), %v1113_v5  ;;  %v1125_v22 = vpack.c.bf16 (!%p217_p9), %v556_v21, %v555_v19  ;;  %v699_v48 = vld [vmem:[%s1496_s4] sm:$0xff] (!%p217_p9)  ;;  %v701_v50 = vld [vmem:[%s1496_s4 + $0x10] sm:$0xff] (!%p217_p9)  ;;  %v702_v52 = vld [vmem:[%s1496_s4 + $0x18] sm:$0xff] (!%p217_p9)  ;;  %s245_s15 = scalar_lea.vmem (!%p217_p9), [#allocation2], %s930_s12  ;;  %s1451_s25 = scalar_lea.sflag (!%p217_p9), [#allocation3], %s243_s11 }
  0x12   : > { %1116 = vmatpush3.bf16.msra.mxu1 (!%p217_p9), %v1113_v5  ;;  %1122 = vmatprep.subr.bf16.mxu0 (!%p217_p9), %v1121_v20  ;;  %v1129_v51 = vpack.c.bf16 (!%p217_p9), %v700_v49, %v699_v48  ;;  %v1133_v53 = vpack.c.bf16 (!%p217_p9), %v702_v52, %v701_v50  ;;  %v703_v54 = vld [vmem:[%s1496_s4 + $0x20] sm:$0xff] (!%p217_p9)  ;;  %v704_v55 = vld [vmem:[%s1496_s4 + $0x28] sm:$0xff] (!%p217_p9)  ;;  %v705_v18 = vld [vmem:[%s1496_s4 + $0x30] sm:$0xff] (!%p217_p9)  ;;  %s864_s17 = sshll.u32 (!%p217_p9), %s245_s15, 4  ;;  %s1250_s28 = smov (!%p217_p9), [#allocation2]   ;;  %s1447_s17 = int_to_ptr.vmem [resolvable:$true] %s864_s17 }
  0x13   : > { %1118 = vmatprep.subr.bf16.mxu1 (!%p217_p9), %v1117_v16  ;;  %v1137_v56 = vpack.c.bf16 (!%p217_p9), %v704_v55, %v703_v54  ;;  %v942_v57 = vld [vmem:[%s1497_s5 + $0x1] ss:$0 sm:$0xff] (!%p217_p9)  ;;  %v706_v19 = vld [vmem:[%s1496_s4 + $0x38] sm:$0xff] (!%p217_p9)  ;;  %v951_v21 = vld [vmem:[%s1497_s5 + $0x2] ss:$0 sm:$0xff] (!%p217_p9)  ;;  %s1190_s29 = sshll.u32 (!%p217_p9), %s1250_s28, 4  ;;  %s1191_s29 = int_to_ptr.vmem [resolvable:$false] %s1190_s29 }
  0x14   : > { %s1192_s9 = scalar_lea.vmem (!%p217_p9), %s1191_s29, 2048  ;;  %p1193_p0 = scmp.lt.s32.totalorder (!%p217_p9), %s1447_s17, %s1191_s29 }
  0x15   : > { %s1506_s13 = smov (!%p247_p10, %s931_s13), 31 }
  0x16   : > { %s932_s18 = sshll.u32 %s1506_s13, 3  ;;  %1120 = vmatpush3.bf16.msra.mxu1 %v1117_v16 }
  0x17   : > { %s250_s26 = scalar_lea.vmem %s1492_s0, %s932_s18  ;;  %1130 = vmatprep.subr.bf16.mxu1 %v1129_v51 }
  0x18   : > { %v253_v6 = vld [vmem:[%s250_s26] sm:$0xff]  ;;  %v254_v7 = vld [vmem:[%s250_s26 + $0x8] sm:$0xff]  ;;  %v255_v8 = vld [vmem:[%s250_s26 + $0x10] sm:$0xff] }
  0x19   : > { %1029 = vmatprep.mubr.msk.f32.mxu0 %vm268_vm0, %v253_v6  ;;  %v256_v9 = vld [vmem:[%s250_s26 + $0x18] sm:$0xff]  ;;  %v257_v10 = vld [vmem:[%s250_s26 + $0x20] sm:$0xff]  ;;  %v258_v11 = vld [vmem:[%s250_s26 + $0x28] sm:$0xff] }
  0x1a   : > { %1030 = vmatmul.mubr.msk.f32.vlgmr.msra.gmra.mrb[0].mxu0 %vm268_vm0, %v254_v7  ;;  %v259_v12 = vld [vmem:[%s250_s26 + $0x30] sm:$0xff]  ;;  %v260_v13 = vld [vmem:[%s250_s26 + $0x38] sm:$0xff]  ;;  %s1186_s26 = scalar_lea.vmem %s1447_s17, 1024 }
  0x1b   : > { %1032 = vmatprep.mubr.msk.f32.mxu0 %vm268_vm0, %v255_v8  ;;  %1124 = vmatpush3.bf16.msra.mxu0 %v1121_v20  ;;  %v1141_v20 = vpack.c.bf16 %v706_v19, %v705_v18  ;;  %p1187_p11 = scmp.ne.s32.totalorder %s1447_s17, %s1186_s26  ;;  %p1194_p1 = scmp.lt.s32.totalorder %s1192_s9, %s1186_s26 }
  0x1c   : > { %1126 = vmatprep.subr.bf16.mxu0 %v1125_v22 }
  0x1d   : > { %p1188_p12 = pnand %p1187_p11, %p1326_p5  ;;  %p1195_p2 = por %p1194_p1, %p1193_p0 }
  0x1e   : > { %1033 = vmatmul.mubr.msk.f32.gmra.mrb[2].mxu0 %vm268_vm0, %v256_v9 }
  0x1f   : > { %1035 = vmatprep.mubr.msk.f32.mxu0 %vm268_vm0, %v257_v10  ;;  %1128 = vmatpush3.bf16.msra.mxu0 %v1125_v22  ;;  %p1189_p13 = pneg %p1188_p12 }
  0x21   : > { %p1196_p3 = pnand %p1195_p2, %p1189_p13 }
  0x22   : > { %1036 = vmatmul.mubr.msk.f32.gmra.mrb[4].mxu0 %vm268_vm0, %v258_v11 }
  0x23   : > { %1038 = vmatprep.mubr.msk.f32.mxu0 %vm268_vm0, %v259_v12 }
  0x26   : > { %1039 = vmatmul.mubr.msk.f32.gmra.mrb[6].mxu0 %vm268_vm0, %v260_v13 }
  0xed   : > { %v1031_v24 = vpop.f32.mrb[0].mxu0 }
  0xee   : > { %v365_v25 = vadd.f32 %v1031_v24, %v933_v23  ;;  %v359_v26 = vpop.f32.mrb[1].mxu0 }
  0xef   : > { %v360_v27 = vadd.f32 %v933_v23, %v359_v26 }
  0xf0   : > { %v399_v30 = vmax.f32 %v365_v25, 0.0 }
  0xf1   : > { %v398_v28 = vmax.f32 %v360_v27, 0.0  ;;  %v1034_v29 = vpop.f32.mrb[2].mxu0 }
  0xf2   : > { %v375_v31 = vadd.f32 %v1034_v29, %v933_v23  ;;  %v369_v32 = vpop.f32.mrb[3].mxu0 }
  0xf3   : > { %v370_v33 = vadd.f32 %v933_v23, %v369_v32  ;;  %1049 = vmatprep.mubr.msk.f32.mxu1 %vm415_vm1, %v398_v28 }
  0xf4   : > { %1050 = vmatmul.mubr.msk.f32.vlgmr.msra.gmra.mrb[0].mxu1 %vm415_vm1, %v399_v30  ;;  %v401_v36 = vmax.f32 %v375_v31, 0.0 }
  0xf5   : > { %v400_v34 = vmax.f32 %v370_v33, 0.0  ;;  %v1037_v35 = vpop.f32.mrb[4].mxu0  ;;  %1132 = vmatpush3.bf16.msra.mxu1 %v1129_v51 }
  0xf6   : > { %v385_v37 = vadd.f32 %v1037_v35, %v933_v23  ;;  %v379_v38 = vpop.f32.mrb[5].mxu0  ;;  %1134 = vmatprep.subr.bf16.mxu1 %v1133_v53 }
  0xf7   : > { %v380_v39 = vadd.f32 %v933_v23, %v379_v38  ;;  %1052 = vmatprep.mubr.msk.f32.mxu1 %vm415_vm1, %v400_v34 }
  0xf8   : > { %1053 = vmatmul.mubr.msk.f32.gmra.mrb[2].mxu1 %vm415_vm1, %v401_v36  ;;  %v403_v42 = vmax.f32 %v385_v37, 0.0 }
  0xf9   : > { %v402_v40 = vmax.f32 %v380_v39, 0.0  ;;  %v1040_v41 = vpop.f32.mrb[6].mxu0  ;;  %1136 = vmatpush3.bf16.msra.mxu1 %v1133_v53 }
  0xfa   : > { %v395_v43 = vadd.f32 %v1040_v41, %v933_v23  ;;  %v389_v44 = vpop.f32.mrb[7].mxu0  ;;  %1138 = vmatprep.subr.bf16.mxu1 %v1137_v56 }
  0xfb   : > { %v390_v45 = vadd.f32 %v933_v23, %v389_v44  ;;  %1055 = vmatprep.mubr.msk.f32.mxu1 %vm415_vm1, %v402_v40 }
  0xfc   : > { %1056 = vmatmul.mubr.msk.f32.gmra.mrb[4].mxu1 %vm415_vm1, %v403_v42  ;;  %v405_v47 = vmax.f32 %v395_v43, 0.0 }
  0xfd   : > { %v404_v46 = vmax.f32 %v390_v45, 0.0  ;;  %1140 = vmatpush3.bf16.msra.mxu1 %v1137_v56 }
  0xfe   : > { %1142 = vmatprep.subr.bf16.mxu1 %v1141_v20 }
  0xff   : > { %1058 = vmatprep.mubr.msk.f32.mxu1 %vm415_vm1, %v404_v46  ;;  %v960_v46 = vld [vmem:[%s1497_s5 + $0x3] ss:$0 sm:$0xff] }
 0x100   : > { %1059 = vmatmul.mubr.msk.f32.gmra.mrb[6].mxu1 %vm415_vm1, %v405_v47 }
 0x101   : > { %1144 = vmatpush3.bf16.msra.mxu1 %v1141_v20 }
 0x1c7   : > { %v1051_v58 = vpop.f32.mrb[0].mxu1 }
 0x1c8   : > { %v512_v59 = vadd.f32 %v1051_v58, %v942_v57  ;;  %v506_v60 = vpop.f32.mrb[1].mxu1 }
 0x1c9   : > { %v507_v61 = vadd.f32 %v942_v57, %v506_v60 }
 0x1ca   : > { %v546_v0 = vmax.f32 %v512_v59, 0.0 }
 0x1cb   : > { %v545_v62 = vmax.f32 %v507_v61, 0.0  ;;  %v1054_v63 = vpop.f32.mrb[2].mxu1 }
 0x1cc   : > { %v522_v1 = vadd.f32 %v1054_v63, %v942_v57  ;;  %v516_v2 = vpop.f32.mrb[3].mxu1 }
 0x1cd   : > { %v517_v3 = vadd.f32 %v942_v57, %v516_v2  ;;  %1069 = vmatprep.mubr.msk.f32.mxu0 %vm415_vm1, %v545_v62 }
 0x1ce   : > { %1070 = vmatmul.mubr.msk.f32.vlgmr.msra.gmra.mrb[8].mxu0 %vm415_vm1, %v546_v0  ;;  %v548_v6 = vmax.f32 %v522_v1, 0.0 }
 0x1cf   : > { %v547_v4 = vmax.f32 %v517_v3, 0.0  ;;  %v1057_v5 = vpop.f32.mrb[4].mxu1 }
 0x1d0   : > { %v532_v7 = vadd.f32 %v1057_v5, %v942_v57  ;;  %v526_v8 = vpop.f32.mrb[5].mxu1 }
 0x1d1   : > { %v527_v9 = vadd.f32 %v942_v57, %v526_v8  ;;  %1072 = vmatprep.mubr.msk.f32.mxu0 %vm415_vm1, %v547_v4 }
 0x1d2   : > { %1073 = vmatmul.mubr.msk.f32.gmra.mrb[10].mxu0 %vm415_vm1, %v548_v6  ;;  %v550_v12 = vmax.f32 %v532_v7, 0.0 }
 0x1d3   : > { %v549_v10 = vmax.f32 %v527_v9, 0.0  ;;  %v1060_v11 = vpop.f32.mrb[6].mxu1 }
 0x1d4   : > { %v542_v13 = vadd.f32 %v1060_v11, %v942_v57  ;;  %v536_v14 = vpop.f32.mrb[7].mxu1 }
 0x1d5   : > { %v537_v15 = vadd.f32 %v942_v57, %v536_v14  ;;  %1075 = vmatprep.mubr.msk.f32.mxu0 %vm415_vm1, %v549_v10 }
 0x1d6   : > { %1076 = vmatmul.mubr.msk.f32.gmra.mrb[12].mxu0 %vm415_vm1, %v550_v12  ;;  %v552_v17 = vmax.f32 %v542_v13, 0.0 }
 0x1d7   : > { %v551_v16 = vmax.f32 %v537_v15, 0.0 }
 0x1d9   : > { %1078 = vmatprep.mubr.msk.f32.mxu0 %vm415_vm1, %v551_v16 }
 0x1da   : > { %1079 = vmatmul.mubr.msk.f32.gmra.mrb[14].mxu0 %vm415_vm1, %v552_v17 }
 0x2a1   : > { %v1071_v22 = vpop.f32.mrb[8].mxu0 }
 0x2a2   : > { %v658_v23 = vadd.f32 %v1071_v22, %v951_v21  ;;  %v652_v24 = vpop.f32.mrb[9].mxu0 }
 0x2a3   : > { %v653_v25 = vadd.f32 %v951_v21, %v652_v24 }
 0x2a4   : > { %v692_v28 = vmax.f32 %v658_v23, 0.0 }
 0x2a5   : > { %v691_v26 = vmax.f32 %v653_v25, 0.0  ;;  %v1074_v27 = vpop.f32.mrb[10].mxu0 }
 0x2a6   : > { %v668_v29 = vadd.f32 %v1074_v27, %v951_v21  ;;  %v662_v30 = vpop.f32.mrb[11].mxu0 }
 0x2a7   : > { %v663_v31 = vadd.f32 %v951_v21, %v662_v30  ;;  %1097 = vmatprep.mubr.msk.f32.mxu1 %vm712_vm2, %v691_v26 }
 0x2a8   : > { %1098 = vmatmul.mubr.msk.f32.vlgmr.msra.gmra.mrb[8].mxu1 %vm712_vm2, %v692_v28  ;;  %v694_v34 = vmax.f32 %v668_v29, 0.0 }
 0x2a9   : > { %v693_v32 = vmax.f32 %v663_v31, 0.0  ;;  %v1077_v33 = vpop.f32.mrb[12].mxu0 }
 0x2aa   : > { %v678_v35 = vadd.f32 %v1077_v33, %v951_v21  ;;  %v672_v36 = vpop.f32.mrb[13].mxu0 }
 0x2ab   : > { %v673_v37 = vadd.f32 %v951_v21, %v672_v36  ;;  %1100 = vmatprep.mubr.msk.f32.mxu1 %vm712_vm2, %v693_v32 }
 0x2ac   : > { %1101 = vmatmul.mubr.msk.f32.gmra.mrb[10].mxu1 %vm712_vm2, %v694_v34  ;;  %v696_v40 = vmax.f32 %v678_v35, 0.0 }
 0x2ad   : > { %v695_v38 = vmax.f32 %v673_v37, 0.0  ;;  %v1080_v39 = vpop.f32.mrb[14].mxu0 }
 0x2ae   : > { %v688_v41 = vadd.f32 %v1080_v39, %v951_v21  ;;  %v682_v42 = vpop.f32.mrb[15].mxu0 }
 0x2af   : > { %v683_v43 = vadd.f32 %v951_v21, %v682_v42  ;;  %1103 = vmatprep.mubr.msk.f32.mxu1 %vm712_vm2, %v695_v38 }
 0x2b0   : > { %1104 = vmatmul.mubr.msk.f32.gmra.mrb[12].mxu1 %vm712_vm2, %v696_v40  ;;  %v698_v45 = vmax.f32 %v688_v41, 0.0 }
 0x2b1   : > { %v697_v44 = vmax.f32 %v683_v43, 0.0 }
 0x2b3   : > { %1106 = vmatprep.mubr.msk.f32.mxu1 %vm712_vm2, %v697_v44 }
 0x2b4   : > { %1107 = vmatmul.mubr.msk.f32.gmra.mrb[14].mxu1 %vm712_vm2, %v698_v45 }
 0x37b   : > { %v1099_v47 = vpop.f32.mrb[8].mxu1 }
 0x37c   : > { %v809_v48 = vadd.f32 %v1099_v47, %v960_v46  ;;  %v803_v49 = vpop.f32.mrb[9].mxu1 }
 0x37d   : > { %v804_v50 = vadd.f32 %v960_v46, %v803_v49 }
 0x37e   : > { %843 = vst [vmem:[%s245_s15 + $0x8] sm:$0xff] %v809_v48 }
 0x37f   : > { %842 = vst [vmem:[%s245_s15] sm:$0xff] %v804_v50  ;;  %v1102_v51 = vpop.f32.mrb[10].mxu1 }
 0x380   : > { %v819_v52 = vadd.f32 %v1102_v51, %v960_v46  ;;  %v813_v53 = vpop.f32.mrb[11].mxu1 }
 0x381   : > { %v814_v54 = vadd.f32 %v960_v46, %v813_v53 }
 0x382   : > { %845 = vst [vmem:[%s245_s15 + $0x18] sm:$0xff] %v819_v52 }
 0x383   : > { %844 = vst [vmem:[%s245_s15 + $0x10] sm:$0xff] %v814_v54  ;;  %v1105_v55 = vpop.f32.mrb[12].mxu1 }
 0x384   : > { %v829_v56 = vadd.f32 %v1105_v55, %v960_v46  ;;  %v823_v57 = vpop.f32.mrb[13].mxu1 }
 0x385   : > { %v824_v58 = vadd.f32 %v960_v46, %v823_v57 }
 0x386   : > { %847 = vst [vmem:[%s245_s15 + $0x28] sm:$0xff] %v829_v56 }
 0x387   : > { %846 = vst [vmem:[%s245_s15 + $0x20] sm:$0xff] %v824_v58  ;;  %v1108_v59 = vpop.f32.mrb[14].mxu1 }
 0x388   : > { %v839_v60 = vadd.f32 %v1108_v59, %v960_v46  ;;  %v833_v61 = vpop.f32.mrb[15].mxu1 }
 0x389   : > { %v834_v62 = vadd.f32 %v960_v46, %v833_v61 }
 0x38a   : > { %849 = vst [vmem:[%s245_s15 + $0x38] sm:$0xff] %v839_v60 }
 0x38b   : > { %848 = vst [vmem:[%s245_s15 + $0x30] sm:$0xff] %v834_v62 }
 0x38c   : > { %1199 = shalt.err (!%p1196_p3)
}
 0x38d   : > { %s1200_s10 = scalar_lea.hbm %s1445_s20, 1024  ;;  %s1204_s13 = scalar_lea.hbm %s1498_s6, 4096 }
 0x38e   : > { %p1201_p4 = scmp.ne.s32.totalorder %s1445_s20, %s1200_s10  ;;  %p1205_p9 = scmp.lt.u32.totalorder %s1445_s20, %s1498_s6 }
 0x38f   : > { %p1206_p10 = scmp.lt.u32.totalorder %s1204_s13, %s1200_s10  ;;  %p1208_p12 = scmp.lt.u32.totalorder %s1200_s10, %s1445_s20 }
 0x390   : > { %p1202_p7 = pnand %p1201_p4, %p1326_p5 }
 0x391   : > { %p1207_p11 = por %p1206_p10, %p1205_p9 }
 0x392   : > { %p1203_p8 = pneg %p1202_p7 }
 0x393   : > { %p1209_p13 = por %p1208_p12, %p1207_p11 }
 0x395   : > { %p1210_p0 = pnand %p1209_p13, %p1203_p8 }
 0x397   : > { %1213 = shalt.err (!%p1210_p0)
}
 0x398   : > { %s1251_s16 = smov 128   ;;  %s1252_s18 = smov 8  }
 0x399   : > { %1145 = dma.vmem_to_hbm [thread:$0]  (%p1326_p5), %s1447_s17, 1024, %s1445_s20, %s1451_s25, %s1251_s16, %s1251_s16, %s1252_s18  }
 0x39a PF: > { %p1151_p1 = scmp.ge.s32.totalorder %s1248_s24, 2  ;;  %s879_s19 = sand.u32 1, %s1236_s21  }
 0x39b   : > { %s880_s26 = scalar_lea.sflag [#allocation3], %s879_s19 }
 0x39c   : > { %p1148_p2 = pnand %p1151_p1, %p1330_p6 }
 0x39e   : > { %1231 = dma.done.wait (!%p1148_p2), %s880_s26, 1024  }
 0x39f   : > { %1233 = vsyncadd (!%p1148_p2), %s880_s26, 4294966272  ;;  %p16_p3 = scmp.ge.s32.totalorder %s1313_s27, 6   ;;  %s1501_s21 = smov %s1240_s22 }
 0x3a0   : > { %s1502_s22 = smov %s1244_s23  ;;  %s1503_s23 = smov %s1324_s30 }
 0x3a1   : > { %s1504_s24 = smov %s1313_s27  ;;  %18 = sbr.rel (!%p16_p3) target bundleno = 3 (0x3), region = 79 }
 0x3a8   :  { %885 = vsyncpa [#allocation3], 1 }
 0x3a9   :  { %887 = vsyncpa [#allocation3 + $0x1], 1 }

</bundles_post_ra>
